<compile_context>
chip_gen: v6e
topology: v6e:2x2x1
jax: 0.10.0
libtpu: 0.0.40
codegen_flags: <defaults>
</compile_context>

<pallas_src>
import functools

import jax
import jax.numpy as jnp
import numpy as np
from jax.experimental import pallas as pl
from jax.experimental.pallas import tpu as pltpu

EPS = 1e-5
LANE = 128          # TPU lane width: pad channel-ish dims to a multiple of it.


# ----------------------------------------------------------------------------
# Small helpers.
# ----------------------------------------------------------------------------
def _round_up(x, m):
  return ((x + m - 1) // m) * m


def _pad2d(a, rows, cols):
  return jnp.pad(a, ((0, rows - a.shape[0]), (0, cols - a.shape[1])))


def _pad_vec(v, cols):
  return jnp.pad(v, (0, cols - v.shape[0])).reshape(1, cols)


def _vmem_budget(block_shapes, *, dtype_bytes=4, buffers=2,
                 floor=16 * 1024 * 1024, ceil=64 * 1024 * 1024):
  """Explicit scoped-VMEM budget: double-buffered blocks + slack, clamped so the
  same config fits v7x's 64 MiB physical VMEM (v5e/v6e have 128 MiB)."""
  need = sum(int(np.prod(s)) for s in block_shapes) * dtype_bytes * buffers
  need += 2 * 1024 * 1024
  return int(min(max(need, floor), ceil))


# ----------------------------------------------------------------------------
# Pallas kernels.
# ----------------------------------------------------------------------------
def _matmul_stats_kernel(x_ref, w_ref, y_ref, stats_ref):
  """One row tile of y = x @ w plus per-tile [sum, sum_sq] over rows (BN pass 1)."""
  y = jnp.dot(x_ref[...], w_ref[...], preferred_element_type=jnp.float32)
  y_ref[...] = y
  s = jnp.sum(y, axis=0, keepdims=True)
  ss = jnp.sum(y * y, axis=0, keepdims=True)
  stats_ref[0] = jnp.concatenate([s, ss], axis=0)


def _residual_epilogue_kernel(y2_ref, id_ref, sc2_ref, sh2_ref,
                              sci_ref, shi_ref, out_ref):
  """out = relu(bn2(y2) + bn_id(identity)) on one lane-dense row tile."""
  y2 = y2_ref[...] * sc2_ref[...] + sh2_ref[...]
  idn = id_ref[...] * sci_ref[...] + shi_ref[...]
  out_ref[...] = jnp.maximum(y2 + idn, 0.0)


# ----------------------------------------------------------------------------
# Pallas call wrappers (gridded over rows, double-buffered pipelining).
# ----------------------------------------------------------------------------
def _matmul_with_stats(x, w, *, tm):
  """y = x @ w  plus per-tile [sum, sum_sq] partials, tiled over rows.

  x: (Mp, K) f32, Mp % tm == 0, K % 128 == 0
  w: (K, Cp) f32, Cp % 128 == 0
  returns: y (Mp, Cp) f32, stats (n_tiles, 2, Cp) f32
  """
  mp, k = x.shape
  _, cp = w.shape
  n_tiles = mp // tm
  cost = pl.CostEstimate(flops=2 * mp * k * cp, transcendentals=0,
                         bytes_accessed=4 * (mp * k + k * cp + mp * cp))
  return pl.pallas_call(
      _matmul_stats_kernel,
      grid=(n_tiles,),
      in_specs=[
          pl.BlockSpec((tm, k), lambda i: (i, 0)),
          pl.BlockSpec((k, cp), lambda i: (0, 0)),   # weight resident across tiles
      ],
      out_specs=(
          pl.BlockSpec((tm, cp), lambda i: (i, 0)),
          pl.BlockSpec((1, 2, cp), lambda i: (i, 0, 0)),
      ),
      out_shape=(
          jax.ShapeDtypeStruct((mp, cp), jnp.float32),
          jax.ShapeDtypeStruct((n_tiles, 2, cp), jnp.float32),
      ),
      compiler_params=pltpu.CompilerParams(
          dimension_semantics=("parallel",),
          vmem_limit_bytes=_vmem_budget(
              [(tm, k), (k, cp), (tm, cp), (1, 2, cp)])),
      cost_estimate=cost,
  )(x, w)


def _residual_epilogue(y2, ident, sc2, sh2, sci, shi, *, tm):
  mp, cp = y2.shape
  n_tiles = mp // tm
  row = lambda i: (i, 0)
  bcast = lambda i: (0, 0)
  return pl.pallas_call(
      _residual_epilogue_kernel,
      grid=(n_tiles,),
      in_specs=[
          pl.BlockSpec((tm, cp), row),
          pl.BlockSpec((tm, cp), row),
          pl.BlockSpec((1, cp), bcast),
          pl.BlockSpec((1, cp), bcast),
          pl.BlockSpec((1, cp), bcast),
          pl.BlockSpec((1, cp), bcast),
      ],
      out_specs=pl.BlockSpec((tm, cp), row),
      out_shape=jax.ShapeDtypeStruct((mp, cp), jnp.float32),
      compiler_params=pltpu.CompilerParams(
          dimension_semantics=("parallel",),
          vmem_limit_bytes=_vmem_budget([(tm, cp)] * 3 + [(1, cp)] * 4)),
  )(y2, ident, sc2, sh2, sci, shi)


# ----------------------------------------------------------------------------
# JAX glue: im2col, BN-stat finalize, parameters, wrapper, reference.
# ----------------------------------------------------------------------------
def _im2col_3x3(x_nhwc, stride):
  """(N,H,W,C) -> (N*Ho*Wo, 9*C) patches for a 3x3/pad=1 conv.  Column order is
  (kh, kw, c), matching a (3,3,Cin,Cout) -> (9*Cin,Cout) row-major reshape."""
  n, h, w, c = x_nhwc.shape
  ho = (h + 2 - 3) // stride + 1
  wo = (w + 2 - 3) // stride + 1
  xp = jnp.pad(x_nhwc, ((0, 0), (1, 1), (1, 1), (0, 0)))
  taps = []
  for kh in range(3):
    for kw in range(3):
      taps.append(xp[:, kh:kh + stride * (ho - 1) + 1:stride,
                     kw:kw + stride * (wo - 1) + 1:stride, :])
  col = jnp.concatenate(taps, axis=-1)                         # (N, Ho, Wo, 9C)
  return col.reshape(n * ho * wo, 9 * c), ho, wo


def _bn_fold(stats, m_rows, gamma, beta, cout):
  """Finalize two-pass BN: per-tile [sum, sum_sq] -> fused scale/shift
  (PyTorch training-mode forward: batch mean, biased variance)."""
  s = jnp.sum(stats[:, 0, :cout], axis=0)
  ss = jnp.sum(stats[:, 1, :cout], axis=0)
  mean = s / m_rows
  var = jnp.maximum(ss / m_rows - mean * mean, 0.0)
  scale = gamma * jax.lax.rsqrt(var + EPS)
  shift = beta - mean * scale
  return scale, shift


def make_basic_block_params(key, input_dim, layer_dim, stride):
  """Deterministic synthetic parameters (shapes match the nn.Module)."""
  output_dim = layer_dim * 1  # expansion = 1
  ks = jax.random.split(key, 9)
  p = {
      # conv weights stored HWIO: (kh, kw, Cin, Cout)
      "w1": 0.1 * jax.random.normal(ks[0], (3, 3, input_dim, output_dim), jnp.float32),
      "w2": 0.1 * jax.random.normal(ks[1], (3, 3, output_dim, output_dim), jnp.float32),
      "g1": 1.0 + 0.1 * jax.random.normal(ks[2], (output_dim,), jnp.float32),
      "b1": 0.1 * jax.random.normal(ks[3], (output_dim,), jnp.float32),
      "g2": 1.0 + 0.1 * jax.random.normal(ks[4], (output_dim,), jnp.float32),
      "b2": 0.1 * jax.random.normal(ks[5], (output_dim,), jnp.float32),
  }
  has_downsample = (input_dim != output_dim) or (stride != 1)
  if has_downsample:  # no dummies otherwise: nothing extra is passed or DMA'd
    p["wds"] = 0.1 * jax.random.normal(ks[6], (input_dim, output_dim), jnp.float32)
    p["gd"] = 1.0 + 0.1 * jax.random.normal(ks[7], (output_dim,), jnp.float32)
    p["bd"] = 0.1 * jax.random.normal(ks[8], (output_dim,), jnp.float32)
  return p, has_downsample


@functools.partial(jax.jit, static_argnames=("stride", "has_downsample", "tm"))
def basic_block_forward(x_nchw, params, stride, has_downsample, tm=128):
  # For real ResNet shapes bump tm to 512-1024 rows: bigger tiles amortize the
  # ~0.35us/grid-step overhead while staying inside _vmem_budget's 64 MiB cap.
  x = jnp.transpose(x_nchw, (0, 2, 3, 1)).astype(jnp.float32)   # NCHW -> NHWC
  n, h, w, cin = x.shape
  cout = params["w1"].shape[-1]
  cp = _round_up(cout, LANE)

  # ---- conv1 (3x3, stride s) as one (rows, 9*Cin) @ (9*Cin, Cout) contraction.
  xcol1, ho, wo = _im2col_3x3(x, stride)
  m = n * ho * wo
  mp = _round_up(m, tm)
  k1 = _round_up(9 * cin, LANE)
  xcol1 = _pad2d(xcol1, mp, k1)
  w1 = _pad2d(params["w1"].reshape(9 * cin, cout), k1, cp)
  y1, st1 = _matmul_with_stats(xcol1, w1, tm=tm)

  # ---- bn1 (two-pass) + relu: fold stats to a fused affine, apply it while
  # building conv2's im2col input (cheap XLA glue; zero pad rows/lanes drop out).
  sc1, sh1 = _bn_fold(st1, m, params["g1"], params["b1"], cout)
  a1 = jnp.maximum(y1[:m, :cout] * sc1 + sh1, 0.0).reshape(n, ho, wo, cout)

  # ---- conv2 (3x3, stride 1): single (rows, 9*Cout) @ (9*Cout, Cout) matmul.
  xcol2, _, _ = _im2col_3x3(a1, 1)
  k2 = _round_up(9 * cout, LANE)
  xcol2 = _pad2d(xcol2, mp, k2)
  w2 = _pad2d(params["w2"].reshape(9 * cout, cout), k2, cp)
  y2, st2 = _matmul_with_stats(xcol2, w2, tm=tm)
  sc2, sh2 = _bn_fold(st2, m, params["g2"], params["b2"], cout)

  # ---- identity / downsample branch.
  if has_downsample:
    cpi = _round_up(cin, LANE)
    xd = _pad2d(x[:, ::stride, ::stride, :].reshape(m, cin), mp, cpi)
    wd = _pad2d(params["wds"], cpi, cp)
    ident, std = _matmul_with_stats(xd, wd, tm=tm)      # 1x1 conv, stride s
    scd, shd = _bn_fold(std, m, params["gd"], params["bd"], cout)
    sci, shi = _pad_vec(scd, cp), _pad_vec(shd, cp)
  else:
    ident = _pad2d(x.reshape(m, cin), mp, cp)           # cin == cout, stride 1
    sci = jnp.ones((1, cp), jnp.float32)
    shi = jnp.zeros((1, cp), jnp.float32)

  # ---- bn2 + residual add + relu on lane-dense (rows, 128k-channel) tiles.
  out2d = _residual_epilogue(y2, ident, _pad_vec(sc2, cp), _pad_vec(sh2, cp),
                             sci, shi, tm=tm)
  out = out2d[:m, :cout].reshape(n, ho, wo, cout)
  return jnp.transpose(out, (0, 3, 1, 2))               # back to NCHW


def reference_forward(x_nchw, params, stride, has_downsample):
  """Pure-JAX (XLA) reference mirroring the PyTorch module in training mode."""
  x = x_nchw.astype(jnp.float32)

  def conv3x3(z, w_hwio, s):
    return jax.lax.conv_general_dilated(
        z, w_hwio, (s, s), padding=[(1, 1), (1, 1)],
        dimension_numbers=("NCHW", "HWIO", "NCHW"))

  def bn(z, g, b):
    m = jnp.mean(z, axis=(0, 2, 3), keepdims=True)
    v = jnp.mean((z - m) ** 2, axis=(0, 2, 3), keepdims=True)
    return (z - m) * jax.lax.rsqrt(v + EPS) * g.reshape(1, -1, 1, 1) \
        + b.reshape(1, -1, 1, 1)

  y = jnp.maximum(bn(conv3x3(x, params["w1"], stride), params["g1"], params["b1"]), 0.0)
  y = bn(conv3x3(y, params["w2"], 1), params["g2"], params["b2"])
  if has_downsample:
    wds = params["wds"].reshape(1, 1, *params["wds"].shape)   # 1x1 HWIO
    ident = jax.lax.conv_general_dilated(
        x, wds, (stride, stride), padding="VALID",
        dimension_numbers=("NCHW", "HWIO", "NCHW"))
    ident = bn(ident, params["gd"], params["bd"])
  else:
    ident = x
  return jnp.maximum(y + ident, 0.0)


if __name__ == "__main__":
  key = jax.random.PRNGKey(0)
  kx, kx2, kp1, kp2 = jax.random.split(key, 4)

  # Config 1: downsample path (input_dim=4 -> layer_dim=8, stride=2).
  x = jax.random.normal(kx, (2, 4, 16, 16), jnp.float32)       # NCHW, like PyTorch
  params1, ds1 = make_basic_block_params(kp1, input_dim=4, layer_dim=8, stride=2)
  out1 = jax.block_until_ready(basic_block_forward(x, params1, stride=2,
                                                   has_downsample=ds1))
  ref1 = reference_forward(x, params1, 2, ds1)
  np.testing.assert_allclose(np.asarray(out1), np.asarray(ref1),
                             rtol=2e-4, atol=2e-4)

  # Config 2: identity path (input_dim == layer_dim == 8, stride=1).
  x2 = jax.random.normal(kx2, (2, 8, 16, 16), jnp.float32)
  params2, ds2 = make_basic_block_params(kp2, input_dim=8, layer_dim=8, stride=1)
  out2 = jax.block_until_ready(basic_block_forward(x2, params2, stride=1,
                                                   has_downsample=ds2))
  ref2 = reference_forward(x2, params2, 1, ds2)
  np.testing.assert_allclose(np.asarray(out2), np.asarray(ref2),
                             rtol=2e-4, atol=2e-4)

  print("KERNEL_OK")
</pallas_src>

<mosaic_0001>
module attributes {stable_mosaic.version = 11 : i64} {
  func.func @_matmul_stats_kernel(%arg0: i32, %arg1: memref<128x128xf32, #tpu.memory_space<vmem>>, %arg2: memref<128x128xf32, #tpu.memory_space<vmem>>, %arg3: memref<128x128xf32, #tpu.memory_space<vmem>>, %arg4: memref<1x2x128xf32, #tpu.memory_space<vmem>>) attributes {dimension_semantics = [#tpu.dimension_semantics<parallel>], iteration_bounds = array<i64: 1>, scalar_prefetch = 0 : i64, scratch_operands = 0 : i64, tpu.core_type = #tpu.core_type<tc>, window_params = [{transform_indices = @transform_0, window_bounds = array<i64: 128, 128>}, {pipeline_mode = #tpu.pipeline_mode<synchronous>, transform_indices = @transform_1, window_bounds = array<i64: 128, 128>}, {transform_indices = @transform_2, window_bounds = array<i64: 128, 128>}, {transform_indices = @transform_3, window_bounds = array<i64: 1, 2, 128>}]} {
    %c0 = arith.constant 0 : index
    %c0_0 = arith.constant 0 : index
    %0 = vector.load %arg1[%c0, %c0_0] : memref<128x128xf32, #tpu.memory_space<vmem>>, vector<128x128xf32>
    %c0_1 = arith.constant 0 : index
    %c0_2 = arith.constant 0 : index
    %1 = vector.load %arg2[%c0_1, %c0_2] : memref<128x128xf32, #tpu.memory_space<vmem>>, vector<128x128xf32>
    %cst = arith.constant dense<0.000000e+00> : vector<128x128xf32>
    %2 = tpu.matmul %0, %1, %cst {dimension_numbers = #tpu.dot_dimension_numbers<[1], [0], [0], [1], [0, 0, 1, 1], [], []>} : vector<128x128xf32>, vector<128x128xf32>, vector<128x128xf32> -> vector<128x128xf32>
    %c0_3 = arith.constant 0 : index
    %c0_4 = arith.constant 0 : index
    %3 = vector.load %arg3[%c0_3, %c0_4] : memref<128x128xf32, #tpu.memory_space<vmem>>, vector<128x128xf32>
    tpu.vector_store %arg3[%c0_3, %c0_4], %2 {strides = array<i32>} : memref<128x128xf32, #tpu.memory_space<vmem>>, vector<128x128xf32>,
    %cst_5 = arith.constant dense<0.000000e+00> : vector<128xf32>
    %4 = vector.multi_reduction <add>, %2, %cst_5 [0] : vector<128x128xf32> to vector<128xf32>
    %5 = vector.shape_cast %4 : vector<128xf32> to vector<1x128xf32>
    %6 = arith.mulf %2, %2 : vector<128x128xf32>
    %cst_6 = arith.constant dense<0.000000e+00> : vector<128xf32>
    %7 = vector.multi_reduction <add>, %6, %cst_6 [0] : vector<128x128xf32> to vector<128xf32>
    %8 = vector.shape_cast %7 : vector<128xf32> to vector<1x128xf32>
    %9 = tpu.concatenate %5, %8 in 0 : vector<1x128xf32>, vector<1x128xf32> -> vector<2x128xf32>
    %c0_7 = arith.constant 0 : index
    %c0_8 = arith.constant 0 : index
    %c0_9 = arith.constant 0 : index
    %10 = vector.load %arg4[%c0_7, %c0_8, %c0_9] : memref<1x2x128xf32, #tpu.memory_space<vmem>>, vector<1x2x128xf32>
    %11 = vector.shape_cast %10 : vector<1x2x128xf32> to vector<2x128xf32>
    %12 = vector.shape_cast %9 : vector<2x128xf32> to vector<1x2x128xf32>
    tpu.vector_store %arg4[%c0_7, %c0_8, %c0_9], %12 {strides = array<i32>} : memref<1x2x128xf32, #tpu.memory_space<vmem>>, vector<1x2x128xf32>,
    return
  }
  func.func @transform_0(%arg0: i32) -> (i32, i32) {
    %c0_i32 = arith.constant 0 : i32
    %c0_i32_0 = arith.constant 0 : i32
    return %arg0, %c0_i32 : i32, i32
  }
  func.func @transform_1(%arg0: i32) -> (i32, i32) {
    %c0_i32 = arith.constant 0 : i32
    %c0_i32_0 = arith.constant 0 : i32
    %c0_i32_1 = arith.constant 0 : i32
    return %c0_i32, %c0_i32_0 : i32, i32
  }
  func.func @transform_2(%arg0: i32) -> (i32, i32) {
    %c0_i32 = arith.constant 0 : i32
    %c0_i32_0 = arith.constant 0 : i32
    return %arg0, %c0_i32 : i32, i32
  }
  func.func @transform_3(%arg0: i32) -> (i32, i32, i32) {
    %c0_i32 = arith.constant 0 : i32
    %c0_i32_0 = arith.constant 0 : i32
    %c0_i32_1 = arith.constant 0 : i32
    return %arg0, %c0_i32, %c0_i32_0 : i32, i32, i32
  }
}

module attributes {stable_mosaic.version = 11 : i64} {
  func.func @_residual_epilogue_kernel(%arg0: i32, %arg1: memref<128x128xf32, #tpu.memory_space<vmem>>, %arg2: memref<128x128xf32, #tpu.memory_space<vmem>>, %arg3: memref<1x128xf32, #tpu.memory_space<vmem>>, %arg4: memref<1x128xf32, #tpu.memory_space<vmem>>, %arg5: memref<1x128xf32, #tpu.memory_space<vmem>>, %arg6: memref<1x128xf32, #tpu.memory_space<vmem>>, %arg7: memref<128x128xf32, #tpu.memory_space<vmem>>) attributes {dimension_semantics = [#tpu.dimension_semantics<parallel>], iteration_bounds = array<i64: 1>, scalar_prefetch = 0 : i64, scratch_operands = 0 : i64, tpu.core_type = #tpu.core_type<tc>, window_params = [{transform_indices = @transform_0, window_bounds = array<i64: 128, 128>}, {transform_indices = @transform_1, window_bounds = array<i64: 128, 128>}, {pipeline_mode = #tpu.pipeline_mode<synchronous>, transform_indices = @transform_2, window_bounds = array<i64: 1, 128>}, {pipeline_mode = #tpu.pipeline_mode<synchronous>, transform_indices = @transform_3, window_bounds = array<i64: 1, 128>}, {pipeline_mode = #tpu.pipeline_mode<synchronous>, transform_indices = @transform_4, window_bounds = array<i64: 1, 128>}, {pipeline_mode = #tpu.pipeline_mode<synchronous>, transform_indices = @transform_5, window_bounds = array<i64: 1, 128>}, {transform_indices = @transform_6, window_bounds = array<i64: 128, 128>}]} {
    %c0 = arith.constant 0 : index
    %c0_0 = arith.constant 0 : index
    %0 = vector.load %arg1[%c0, %c0_0] : memref<128x128xf32, #tpu.memory_space<vmem>>, vector<128x128xf32>
    %c0_1 = arith.constant 0 : index
    %c0_2 = arith.constant 0 : index
    %1 = vector.load %arg3[%c0_1, %c0_2] : memref<1x128xf32, #tpu.memory_space<vmem>>, vector<1x128xf32>
    %2 = vector.broadcast %1 : vector<1x128xf32> to vector<128x128xf32>
    %3 = arith.mulf %0, %2 : vector<128x128xf32>
    %c0_3 = arith.constant 0 : index
    %c0_4 = arith.constant 0 : index
    %4 = vector.load %arg4[%c0_3, %c0_4] : memref<1x128xf32, #tpu.memory_space<vmem>>, vector<1x128xf32>
    %5 = vector.broadcast %4 : vector<1x128xf32> to vector<128x128xf32>
    %6 = arith.addf %3, %5 : vector<128x128xf32>
    %c0_5 = arith.constant 0 : index
    %c0_6 = arith.constant 0 : index
    %7 = vector.load %arg2[%c0_5, %c0_6] : memref<128x128xf32, #tpu.memory_space<vmem>>, vector<128x128xf32>
    %c0_7 = arith.constant 0 : index
    %c0_8 = arith.constant 0 : index
    %8 = vector.load %arg5[%c0_7, %c0_8] : memref<1x128xf32, #tpu.memory_space<vmem>>, vector<1x128xf32>
    %9 = vector.broadcast %8 : vector<1x128xf32> to vector<128x128xf32>
    %10 = arith.mulf %7, %9 : vector<128x128xf32>
    %c0_9 = arith.constant 0 : index
    %c0_10 = arith.constant 0 : index
    %11 = vector.load %arg6[%c0_9, %c0_10] : memref<1x128xf32, #tpu.memory_space<vmem>>, vector<1x128xf32>
    %12 = vector.broadcast %11 : vector<1x128xf32> to vector<128x128xf32>
    %13 = arith.addf %10, %12 : vector<128x128xf32>
    %14 = arith.addf %6, %13 : vector<128x128xf32>
    %cst = arith.constant 0.000000e+00 : f32
    %15 = vector.broadcast %cst : f32 to vector<128x128xf32>
    %16 = arith.maximumf %14, %15 : vector<128x128xf32>
    %c0_11 = arith.constant 0 : index
    %c0_12 = arith.constant 0 : index
    %17 = vector.load %arg7[%c0_11, %c0_12] : memref<128x128xf32, #tpu.memory_space<vmem>>, vector<128x128xf32>
    tpu.vector_store %arg7[%c0_11, %c0_12], %16 {strides = array<i32>} : memref<128x128xf32, #tpu.memory_space<vmem>>, vector<128x128xf32>,
    return
  }
  func.func @transform_0(%arg0: i32) -> (i32, i32) {
    %c0_i32 = arith.constant 0 : i32
    %c0_i32_0 = arith.constant 0 : i32
    return %arg0, %c0_i32 : i32, i32
  }
  func.func @transform_1(%arg0: i32) -> (i32, i32) {
    %c0_i32 = arith.constant 0 : i32
    %c0_i32_0 = arith.constant 0 : i32
    return %arg0, %c0_i32 : i32, i32
  }
  func.func @transform_2(%arg0: i32) -> (i32, i32) {
    %c0_i32 = arith.constant 0 : i32
    %c0_i32_0 = arith.constant 0 : i32
    %c0_i32_1 = arith.constant 0 : i32
    return %c0_i32, %c0_i32_0 : i32, i32
  }
  func.func @transform_3(%arg0: i32) -> (i32, i32) {
    %c0_i32 = arith.constant 0 : i32
    %c0_i32_0 = arith.constant 0 : i32
    %c0_i32_1 = arith.constant 0 : i32
    return %c0_i32, %c0_i32_0 : i32, i32
  }
  func.func @transform_4(%arg0: i32) -> (i32, i32) {
    %c0_i32 = arith.constant 0 : i32
    %c0_i32_0 = arith.constant 0 : i32
    %c0_i32_1 = arith.constant 0 : i32
    return %c0_i32, %c0_i32_0 : i32, i32
  }
  func.func @transform_5(%arg0: i32) -> (i32, i32) {
    %c0_i32 = arith.constant 0 : i32
    %c0_i32_0 = arith.constant 0 : i32
    %c0_i32_1 = arith.constant 0 : i32
    return %c0_i32, %c0_i32_0 : i32, i32
  }
  func.func @transform_6(%arg0: i32) -> (i32, i32) {
    %c0_i32 = arith.constant 0 : i32
    %c0_i32_0 = arith.constant 0 : i32
    return %arg0, %c0_i32 : i32, i32
  }
}

</mosaic_0001>

<bundles_post_ra>
// kernel: basic_block_forward.6
= control target key start
LH: loop header
LB: loop body
LE: loop exit
PB: predicated region body
PF: predicated region fallthrough
CT: control target
= control target key end

     0   :  { %vm264_vm0 = vcmask 1040384   ;;  %s562_s1 = inlined_call_operand.vmem [shape: f32[128,128], index: 1, kind: input, shape index: {}]   ;;  %s563_s0 = inlined_call_operand.vmem [shape: f32[128,128], index: 0, kind: input, shape index: {}]   ;;  %s564_s2 = inlined_call_operand.vmem [shape: f32[128,128], index: 2, kind: output, shape index: {0}]   ;;  %s565_s3 = inlined_call_operand.vmem [shape: f32[1,2,128], index: 3, kind: output, shape index: {1}]  }
   0x1   :  { %v44_v0 = vld [vmem:[%s562_s1 + $0x78] sm:$0xff]  ;;  %v43_v1 = vld [vmem:[%s562_s1 + $0x70] sm:$0xff]  ;;  %v42_v2 = vld [vmem:[%s562_s1 + $0x68] sm:$0xff] }
   0x2   :  { %307 = vmatprep.subr.mxu0 %v44_v0  ;;  %363 = vmatprep.subr.mxu1 %v44_v0  ;;  %v41_v3 = vld [vmem:[%s562_s1 + $0x60] sm:$0xff]  ;;  %v40_v4 = vld [vmem:[%s562_s1 + $0x58] sm:$0xff]  ;;  %v39_v5 = vld [vmem:[%s562_s1 + $0x50] sm:$0xff] }
   0x3   :  { %308 = vmatpush3.msra.mxu0 %v44_v0  ;;  %379 = vmatpush3.msra.mxu1 %v44_v0  ;;  %v38_v6 = vld [vmem:[%s562_s1 + $0x48] sm:$0xff]  ;;  %v37_v7 = vld [vmem:[%s562_s1 + $0x40] sm:$0xff]  ;;  %v36_v8 = vld [vmem:[%s562_s1 + $0x38] sm:$0xff] }
   0x4   :  { %309 = vmatprep.subr.mxu0 %v43_v1  ;;  %364 = vmatprep.subr.mxu1 %v43_v1  ;;  %v35_v9 = vld [vmem:[%s562_s1 + $0x30] sm:$0xff]  ;;  %v13_v10 = vld [vmem:[%s563_s0] sm:$0xff]  ;;  %v34_v11 = vld [vmem:[%s562_s1 + $0x28] sm:$0xff] }
   0x5   :  { %310 = vmatpush3.msra.mxu0 %v43_v1  ;;  %380 = vmatpush3.msra.mxu1 %v43_v1  ;;  %v33_v12 = vld [vmem:[%s562_s1 + $0x20] sm:$0xff]  ;;  %v32_v13 = vld [vmem:[%s562_s1 + $0x18] sm:$0xff]  ;;  %v31_v14 = vld [vmem:[%s562_s1 + $0x10] sm:$0xff] }
   0x6   :  { %311 = vmatprep.subr.mxu0 %v42_v2  ;;  %365 = vmatprep.subr.mxu1 %v42_v2  ;;  %v30_v15 = vld [vmem:[%s562_s1 + $0x8] sm:$0xff]  ;;  %v29_v16 = vld [vmem:[%s562_s1] sm:$0xff]  ;;  %v15_v18 = vld [vmem:[%s563_s0 + $0x10] sm:$0xff] }
   0x7   :  { %312 = vmatpush3.msra.mxu0 %v42_v2  ;;  %381 = vmatpush3.msra.mxu1 %v42_v2  ;;  %v14_v17 = vld [vmem:[%s563_s0 + $0x8] sm:$0xff]  ;;  %v21_v19 = vld [vmem:[%s563_s0 + $0x40] sm:$0xff]  ;;  %v23_v21 = vld [vmem:[%s563_s0 + $0x50] sm:$0xff] }
   0x8   :  { %313 = vmatprep.subr.mxu0 %v41_v3  ;;  %366 = vmatprep.subr.mxu1 %v41_v3  ;;  %v22_v20 = vld [vmem:[%s563_s0 + $0x48] sm:$0xff]  ;;  %v16_v22 = vld [vmem:[%s563_s0 + $0x18] sm:$0xff]  ;;  %v17_v23 = vld [vmem:[%s563_s0 + $0x20] sm:$0xff] }
   0x9   :  { %314 = vmatpush3.msra.mxu0 %v41_v3  ;;  %382 = vmatpush3.msra.mxu1 %v41_v3  ;;  %v24_v24 = vld [vmem:[%s563_s0 + $0x58] sm:$0xff]  ;;  %v25_v25 = vld [vmem:[%s563_s0 + $0x60] sm:$0xff]  ;;  %v18_v26 = vld [vmem:[%s563_s0 + $0x28] sm:$0xff] }
   0xa   :  { %315 = vmatprep.subr.mxu0 %v40_v4  ;;  %367 = vmatprep.subr.mxu1 %v40_v4  ;;  %v19_v27 = vld [vmem:[%s563_s0 + $0x30] sm:$0xff]  ;;  %v26_v28 = vld [vmem:[%s563_s0 + $0x68] sm:$0xff]  ;;  %v20_v30 = vld [vmem:[%s563_s0 + $0x38] sm:$0xff] }
   0xb   :  { %316 = vmatpush3.msra.mxu0 %v40_v4  ;;  %383 = vmatpush3.msra.mxu1 %v40_v4  ;;  %v27_v29 = vld [vmem:[%s563_s0 + $0x70] sm:$0xff]  ;;  %v28_v31 = vld [vmem:[%s563_s0 + $0x78] sm:$0xff] }
   0xc   :  { %317 = vmatprep.subr.mxu0 %v39_v5  ;;  %368 = vmatprep.subr.mxu1 %v39_v5 }
   0xd   :  { %318 = vmatpush3.msra.mxu0 %v39_v5  ;;  %384 = vmatpush3.msra.mxu1 %v39_v5 }
   0xe   :  { %319 = vmatprep.subr.mxu0 %v38_v6  ;;  %369 = vmatprep.subr.mxu1 %v38_v6 }
   0xf   :  { %320 = vmatpush3.msra.mxu0 %v38_v6  ;;  %385 = vmatpush3.msra.mxu1 %v38_v6 }
  0x10   :  { %321 = vmatprep.subr.mxu0 %v37_v7  ;;  %370 = vmatprep.subr.mxu1 %v37_v7 }
  0x11   :  { %322 = vmatpush3.msra.mxu0 %v37_v7  ;;  %386 = vmatpush3.msra.mxu1 %v37_v7 }
  0x12   :  { %323 = vmatprep.subr.mxu0 %v36_v8  ;;  %371 = vmatprep.subr.mxu1 %v36_v8 }
  0x13   :  { %324 = vmatpush3.msra.mxu0 %v36_v8  ;;  %387 = vmatpush3.msra.mxu1 %v36_v8 }
  0x14   :  { %325 = vmatprep.subr.mxu0 %v35_v9  ;;  %339 = vmatprep.mubr.f32.mxu0 %v13_v10 }
  0x15   :  { %326 = vmatpush3.msra.mxu0 %v35_v9  ;;  %372 = vmatprep.subr.mxu1 %v35_v9 }
  0x16   :  { %327 = vmatprep.subr.mxu0 %v34_v11  ;;  %388 = vmatpush3.msra.mxu1 %v35_v9 }
  0x17   :  { %328 = vmatpush3.msra.mxu0 %v34_v11  ;;  %373 = vmatprep.subr.mxu1 %v34_v11 }
  0x18   :  { %329 = vmatprep.subr.mxu0 %v33_v12  ;;  %389 = vmatpush3.msra.mxu1 %v34_v11 }
  0x19   :  { %330 = vmatpush3.msra.mxu0 %v33_v12  ;;  %374 = vmatprep.subr.mxu1 %v33_v12 }
  0x1a   :  { %331 = vmatprep.subr.mxu0 %v32_v13  ;;  %390 = vmatpush3.msra.mxu1 %v33_v12 }
  0x1b   :  { %332 = vmatpush3.msra.mxu0 %v32_v13  ;;  %375 = vmatprep.subr.mxu1 %v32_v13 }
  0x1c   :  { %333 = vmatprep.subr.mxu0 %v31_v14  ;;  %391 = vmatpush3.msra.mxu1 %v32_v13 }
  0x1d   :  { %334 = vmatpush3.msra.mxu0 %v31_v14  ;;  %376 = vmatprep.subr.mxu1 %v31_v14 }
  0x1e   :  { %335 = vmatprep.subr.mxu0 %v30_v15  ;;  %392 = vmatpush3.msra.mxu1 %v31_v14 }
  0x1f   :  { %336 = vmatpush3.msra.mxu0 %v30_v15  ;;  %377 = vmatprep.subr.mxu1 %v30_v15 }
  0x20   :  { %337 = vmatprep.subr.mxu0 %v29_v16  ;;  %393 = vmatpush3.msra.mxu1 %v30_v15 }
  0x21   :  { %338 = vmatpush3.msra.mxu0 %v29_v16  ;;  %378 = vmatprep.subr.mxu1 %v29_v16 }
  0x22   :  { %340 = vmatmul.mubr.f32.vlgmr.msra.gmra.mxu0 %v14_v17  ;;  %394 = vmatpush3.msra.mxu1 %v29_v16 }
  0x23   :  { %342 = vmatprep.mubr.f32.mxu0 %v15_v18  ;;  %351 = vmatprep.mubr.f32.mxu1 %v21_v19 }
  0x24   :  { %352 = vmatmul.mubr.f32.vlgmr.msra.gmra.mxu1 %v22_v20 }
  0x25   :  { %354 = vmatprep.mubr.f32.mxu1 %v23_v21 }
  0x26   :  { %343 = vmatmul.mubr.f32.gmra.mxu0 %v16_v22 }
  0x27   :  { %345 = vmatprep.mubr.f32.mxu0 %v17_v23 }
  0x28   :  { %355 = vmatmul.mubr.f32.gmra.mxu1 %v24_v24 }
  0x29   :  { %357 = vmatprep.mubr.f32.mxu1 %v25_v25 }
  0x2a   :  { %346 = vmatmul.mubr.f32.gmra.mxu0 %v18_v26 }
  0x2b   :  { %348 = vmatprep.mubr.f32.mxu0 %v19_v27 }
  0x2c   :  { %358 = vmatmul.mubr.f32.gmra.mxu1 %v26_v28 }
  0x2d   :  { %360 = vmatprep.mubr.f32.mxu1 %v27_v29 }
  0x2e   :  { %349 = vmatmul.mubr.f32.gmra.mxu0 %v20_v30 }
  0x30   :  { %361 = vmatmul.mubr.f32.gmra.mxu1 %v28_v31 }
  0xe2   :  { %v341_v32 = vpop.f32.mrf.mxu0 }
  0xe3   :  { %191 = vst [vmem:[%s564_s2 + $0x8] sm:$0xff] %v341_v32  ;;  %v228_v38 = vmul.f32 %v341_v32, %v341_v32 }
  0xe4   :  { %v111_v33 = vpop.f32.mrf.mxu0  ;;  %v353_v34 = vpop.f32.mrf.mxu1 }
  0xe5   :  { %190 = vst [vmem:[%s564_s2] sm:$0xff] %v111_v33  ;;  %v227_v35 = vmul.f32 %v111_v33, %v111_v33  ;;  %199 = vst [vmem:[%s564_s2 + $0x48] sm:$0xff] %v353_v34  ;;  %v206_v39 = vadd.f32 %v341_v32, %v111_v33  ;;  %v236_v8 = vmul.f32 %v353_v34, %v353_v34 }
  0xe6   :  { %v344_v36 = vpop.f32.mrf.mxu0  ;;  %v151_v37 = vpop.f32.mrf.mxu1 }
  0xe7   :  { %193 = vst [vmem:[%s564_s2 + $0x18] sm:$0xff] %v344_v36  ;;  %198 = vst [vmem:[%s564_s2 + $0x40] sm:$0xff] %v151_v37  ;;  %v243_v42 = vadd.f32 %v228_v38, %v227_v35  ;;  %v230_v47 = vmul.f32 %v344_v36, %v344_v36  ;;  %v235_v7 = vmul.f32 %v151_v37, %v151_v37 }
  0xe8   :  { %v121_v40 = vpop.f32.mrf.mxu0  ;;  %v356_v41 = vpop.f32.mrf.mxu1 }
  0xe9   :  { %192 = vst [vmem:[%s564_s2 + $0x10] sm:$0xff] %v121_v40  ;;  %v207_v43 = vadd.f32 %v206_v39, %v121_v40  ;;  %v229_v44 = vmul.f32 %v121_v40, %v121_v40  ;;  %201 = vst [vmem:[%s564_s2 + $0x58] sm:$0xff] %v356_v41  ;;  %v238_v14 = vmul.f32 %v356_v41, %v356_v41 }
  0xea   :  { %v347_v45 = vpop.f32.mrf.mxu0  ;;  %v161_v46 = vpop.f32.mrf.mxu1 }
  0xeb   :  { %v244_v48 = vadd.f32 %v243_v42, %v229_v44  ;;  %195 = vst [vmem:[%s564_s2 + $0x28] sm:$0xff] %v347_v45  ;;  %v208_v49 = vadd.f32 %v344_v36, %v207_v43  ;;  %200 = vst [vmem:[%s564_s2 + $0x50] sm:$0xff] %v161_v46  ;;  %v232_v57 = vmul.f32 %v347_v45, %v347_v45 }
  0xec   :  { %v131_v50 = vpop.f32.mrf.mxu0  ;;  %v359_v51 = vpop.f32.mrf.mxu1  ;;  %v237_v12 = vmul.f32 %v161_v46, %v161_v46 }
  0xed   :  { %194 = vst [vmem:[%s564_s2 + $0x20] sm:$0xff] %v131_v50  ;;  %v209_v52 = vadd.f32 %v208_v49, %v131_v50  ;;  %v231_v53 = vmul.f32 %v131_v50, %v131_v50  ;;  %v245_v54 = vadd.f32 %v244_v48, %v230_v47  ;;  %203 = vst [vmem:[%s564_s2 + $0x68] sm:$0xff] %v359_v51 }
  0xee   :  { %v350_v55 = vpop.f32.mrf.mxu0  ;;  %v171_v56 = vpop.f32.mrf.mxu1  ;;  %v240_v20 = vmul.f32 %v359_v51, %v359_v51 }
  0xef   :  { %v246_v58 = vadd.f32 %v245_v54, %v231_v53  ;;  %197 = vst [vmem:[%s564_s2 + $0x38] sm:$0xff] %v350_v55  ;;  %v210_v59 = vadd.f32 %v347_v45, %v209_v52  ;;  %202 = vst [vmem:[%s564_s2 + $0x60] sm:$0xff] %v171_v56  ;;  %v234_v2 = vmul.f32 %v350_v55, %v350_v55 }
  0xf0   :  { %v141_v60 = vpop.f32.mrf.mxu0  ;;  %v362_v61 = vpop.f32.mrf.mxu1  ;;  %v239_v18 = vmul.f32 %v171_v56, %v171_v56 }
  0xf1   :  { %196 = vst [vmem:[%s564_s2 + $0x30] sm:$0xff] %v141_v60  ;;  %v211_v62 = vadd.f32 %v210_v59, %v141_v60  ;;  %v233_v63 = vmul.f32 %v141_v60, %v141_v60  ;;  %v247_v0 = vadd.f32 %v246_v58, %v232_v57  ;;  %205 = vst [vmem:[%s564_s2 + $0x78] sm:$0xff] %v362_v61 }
  0xf2   :  { %v181_v1 = vpop.f32.mrf.mxu1  ;;  %v242_v26 = vmul.f32 %v362_v61, %v362_v61 }
  0xf3   :  { %v212_v3 = vadd.f32 %v350_v55, %v211_v62  ;;  %v248_v4 = vadd.f32 %v247_v0, %v233_v63  ;;  %204 = vst [vmem:[%s564_s2 + $0x70] sm:$0xff] %v181_v1  ;;  %v241_v24 = vmul.f32 %v181_v1, %v181_v1 }
  0xf5   :  { %v249_v5 = vadd.f32 %v248_v4, %v234_v2  ;;  %v213_v6 = vadd.f32 %v212_v3, %v151_v37 }
  0xf7   :  { %v250_v9 = vadd.f32 %v249_v5, %v235_v7  ;;  %v214_v10 = vadd.f32 %v353_v34, %v213_v6 }
  0xf9   :  { %v215_v11 = vadd.f32 %v214_v10, %v161_v46  ;;  %v251_v13 = vadd.f32 %v250_v9, %v236_v8 }
  0xfb   :  { %v252_v15 = vadd.f32 %v251_v13, %v237_v12  ;;  %v216_v16 = vadd.f32 %v356_v41, %v215_v11 }
  0xfd   :  { %v217_v17 = vadd.f32 %v216_v16, %v171_v56  ;;  %v253_v19 = vadd.f32 %v252_v15, %v238_v14 }
  0xff   :  { %v254_v21 = vadd.f32 %v253_v19, %v239_v18  ;;  %v218_v22 = vadd.f32 %v359_v51, %v217_v17 }
 0x101   :  { %v219_v23 = vadd.f32 %v218_v22, %v181_v1  ;;  %v255_v25 = vadd.f32 %v254_v21, %v240_v20 }
 0x103   :  { %v220_v27 = vadd.f32 %v362_v61, %v219_v23  ;;  %v256_v28 = vadd.f32 %v255_v25, %v241_v24 }
 0x105   :  { %v221_v29 = vrot.slane %v220_v27, 4  ;;  %v257_v30 = vadd.f32 %v256_v28, %v242_v26 }
 0x107   :  { %v222_v31 = vadd.f32 %v221_v29, %v220_v27  ;;  %v258_v32 = vrot.slane %v257_v30, 4 }
 0x109   :  { %v223_v33 = vrot.slane %v222_v31, 2  ;;  %v259_v34 = vadd.f32 %v258_v32, %v257_v30 }
 0x10b   :  { %v224_v35 = vadd.f32 %v223_v33, %v222_v31  ;;  %v260_v36 = vrot.slane %v259_v34, 2 }
 0x10d   :  { %v225_v37 = vrot.slane %v224_v35, 1  ;;  %v261_v38 = vadd.f32 %v260_v36, %v259_v34 }
 0x10f   :  { %v262_v39 = vrot.slane %v261_v38, 1  ;;  %v226_v40 = vadd.f32 %v225_v37, %v224_v35 }
 0x111   :  { %v263_v41 = vadd.f32 %v262_v39, %v261_v38 }
 0x113   :  { %v265_v42 = vsel %vm264_vm0, %v226_v40, %v263_v41 }
 0x114   :  { %266 = vst [vmem:[%s565_s3] sm:$0x3] %v265_v42 }

// kernel: basic_block_forward.7
= control target key start
LH: loop header
LB: loop body
LE: loop exit
PB: predicated region body
PF: predicated region fallthrough
CT: control target
= control target key end

     0   :  { %s466_s0 = inlined_call_operand.vmem [shape: f32[128,128], index: 0, kind: input, shape index: {}]   ;;  %s467_s1 = inlined_call_operand.vmem [shape: f32[128,128], index: 1, kind: input, shape index: {}]   ;;  %s468_s2 = inlined_call_operand.vmem [shape: f32[1,128], index: 2, kind: input, shape index: {}]   ;;  %s469_s3 = inlined_call_operand.vmem [shape: f32[1,128], index: 3, kind: input, shape index: {}]   ;;  %s470_s4 = inlined_call_operand.vmem [shape: f32[1,128], index: 4, kind: input, shape index: {}]   ;;  %s471_s5 = inlined_call_operand.vmem [shape: f32[1,128], index: 5, kind: input, shape index: {}]   ;;  %s472_s6 = inlined_call_operand.vmem [shape: f32[128,128], index: 6, kind: output, shape index: {}]  }
   0x1   :  { %v23_v0 = vld [vmem:[%s466_s0] sm:$0xff]  ;;  %v24_v8 = vld [vmem:[%s466_s0 + $0x8] sm:$0xff]  ;;  %v25_v10 = vld [vmem:[%s466_s0 + $0x10] sm:$0xff] }
   0x2   :  { %v244_v1 = vld [vmem:[%s468_s2] ss:$0 sm:$0xff]  ;;  %v86_v9 = vld [vmem:[%s467_s1 + $0x8] sm:$0xff]  ;;  %v87_v15 = vld [vmem:[%s467_s1 + $0x10] sm:$0xff] }
   0x3   :  { %v249_v2 = vld [vmem:[%s469_s3] ss:$0 sm:$0xff]  ;;  %v46_v3 = vmul.f32 %v244_v1, %v23_v0  ;;  %v47_v12 = vmul.f32 %v244_v1, %v24_v8  ;;  %v48_v14 = vmul.f32 %v244_v1, %v25_v10  ;;  %v26_v16 = vld [vmem:[%s466_s0 + $0x18] sm:$0xff]  ;;  %v28_v24 = vld [vmem:[%s466_s0 + $0x28] sm:$0xff] }
   0x4   :  { %v85_v4 = vld [vmem:[%s467_s1] sm:$0xff]  ;;  %v88_v17 = vld [vmem:[%s467_s1 + $0x18] sm:$0xff]  ;;  %v49_v20 = vmul.f32 %v244_v1, %v26_v16  ;;  %v90_v29 = vld [vmem:[%s467_s1 + $0x28] sm:$0xff]  ;;  %v51_v38 = vmul.f32 %v244_v1, %v28_v24 }
   0x5   :  { %v258_v5 = vld [vmem:[%s470_s4] ss:$0 sm:$0xff]  ;;  %v69_v11 = vadd.f32 %v249_v2, %v46_v3  ;;  %v70_v25 = vadd.f32 %v249_v2, %v47_v12  ;;  %v71_v27 = vadd.f32 %v249_v2, %v48_v14  ;;  %v29_v34 = vld [vmem:[%s466_s0 + $0x30] sm:$0xff]  ;;  %v30_v44 = vld [vmem:[%s466_s0 + $0x38] sm:$0xff] }
   0x6   :  { %v263_v6 = vld [vmem:[%s471_s5] ss:$0 sm:$0xff]  ;;  %v108_v7 = vmul.f32 %v258_v5, %v85_v4  ;;  %v109_v13 = vmul.f32 %v258_v5, %v86_v9  ;;  %v110_v19 = vmul.f32 %v258_v5, %v87_v15  ;;  %v111_v21 = vmul.f32 %v258_v5, %v88_v17  ;;  %v91_v39 = vld [vmem:[%s467_s1 + $0x30] sm:$0xff]  ;;  %v92_v45 = vld [vmem:[%s467_s1 + $0x38] sm:$0xff] }
   0x7   :  { %v27_v22 = vld [vmem:[%s466_s0 + $0x20] sm:$0xff]  ;;  %v72_v32 = vadd.f32 %v249_v2, %v49_v20  ;;  %v113_v43 = vmul.f32 %v258_v5, %v90_v29  ;;  %v74_v48 = vadd.f32 %v249_v2, %v51_v38  ;;  %v52_v49 = vmul.f32 %v244_v1, %v29_v34  ;;  %v32_v56 = vld [vmem:[%s466_s0 + $0x48] sm:$0xff]  ;;  %v33_v4 = vld [vmem:[%s466_s0 + $0x50] sm:$0xff] }
   0x8   :  { %v131_v18 = vadd.f32 %v263_v6, %v108_v7  ;;  %v89_v23 = vld [vmem:[%s467_s1 + $0x20] sm:$0xff]  ;;  %v132_v26 = vadd.f32 %v263_v6, %v109_v13  ;;  %v50_v28 = vmul.f32 %v244_v1, %v27_v22  ;;  %v133_v31 = vadd.f32 %v263_v6, %v110_v19  ;;  %v94_v3 = vld [vmem:[%s467_s1 + $0x48] sm:$0xff]  ;;  %v34_v12 = vld [vmem:[%s466_s0 + $0x58] sm:$0xff] }
   0x9   :  { %v134_v33 = vadd.f32 %v263_v6, %v111_v21  ;;  %v112_v37 = vmul.f32 %v258_v5, %v89_v23  ;;  %v31_v50 = vld [vmem:[%s466_s0 + $0x40] sm:$0xff]  ;;  %v136_v54 = vadd.f32 %v263_v6, %v113_v43  ;;  %v114_v55 = vmul.f32 %v258_v5, %v91_v39  ;;  %v96_v17 = vld [vmem:[%s467_s1 + $0x58] sm:$0xff]  ;;  %v37_v34 = vld [vmem:[%s466_s0 + $0x70] sm:$0xff] }
   0xa   :  { %v147_v30 = vadd.f32 %v131_v18, %v69_v11  ;;  %v148_v35 = vadd.f32 %v132_v26, %v70_v25  ;;  %v73_v36 = vadd.f32 %v249_v2, %v50_v28  ;;  %v149_v41 = vadd.f32 %v133_v31, %v71_v27  ;;  %v93_v51 = vld [vmem:[%s467_s1 + $0x40] sm:$0xff]  ;;  %v95_v11 = vld [vmem:[%s467_s1 + $0x50] sm:$0xff]  ;;  %v36_v28 = vld [vmem:[%s466_s0 + $0x68] sm:$0xff] }
   0xb   :  { %v150_v42 = vadd.f32 %v134_v33, %v72_v32  ;;  %v135_v47 = vadd.f32 %v263_v6, %v112_v37  ;;  %v75_v58 = vadd.f32 %v249_v2, %v52_v49  ;;  %v53_v59 = vmul.f32 %v244_v1, %v30_v44  ;;  %v35_v22 = vld [vmem:[%s466_s0 + $0x60] sm:$0xff]  ;;  %v98_v33 = vld [vmem:[%s467_s1 + $0x68] sm:$0xff]  ;;  %v99_v43 = vld [vmem:[%s467_s1 + $0x70] sm:$0xff] }
   0xc   :  { %v163_v40 = vmax.f32 %v147_v30, 0.0  ;;  %v164_v46 = vmax.f32 %v148_v35, 0.0  ;;  %v165_v52 = vmax.f32 %v149_v41, 0.0  ;;  %v115_v60 = vmul.f32 %v258_v5, %v92_v45  ;;  %v97_v27 = vld [vmem:[%s467_s1 + $0x60] sm:$0xff]  ;;  %v100_v49 = vld [vmem:[%s467_s1 + $0x78] sm:$0xff] }
   0xd   :  { %v166_v53 = vmax.f32 %v150_v42, 0.0  ;;  %v151_v57 = vadd.f32 %v135_v47, %v73_v36  ;;  %v152_v61 = vadd.f32 %v136_v54, %v74_v48  ;;  %v137_v62 = vadd.f32 %v263_v6, %v114_v55  ;;  %v38_v48 = vld [vmem:[%s466_s0 + $0x78] sm:$0xff] }
   0xe   :  { %179 = vst [vmem:[%s472_s6] sm:$0xff] %v163_v40  ;;  %180 = vst [vmem:[%s472_s6 + $0x8] sm:$0xff] %v164_v46  ;;  %v54_v63 = vmul.f32 %v244_v1, %v31_v50  ;;  %v116_v0 = vmul.f32 %v258_v5, %v93_v51  ;;  %v76_v8 = vadd.f32 %v249_v2, %v53_v59 }
   0xf   :  { %181 = vst [vmem:[%s472_s6 + $0x10] sm:$0xff] %v165_v52  ;;  %182 = vst [vmem:[%s472_s6 + $0x18] sm:$0xff] %v166_v53  ;;  %v167_v7 = vmax.f32 %v151_v57, 0.0  ;;  %v138_v9 = vadd.f32 %v263_v6, %v115_v60  ;;  %v55_v10 = vmul.f32 %v244_v1, %v32_v56  ;;  %v168_v13 = vmax.f32 %v152_v61, 0.0 }
  0x10   :  { %v153_v14 = vadd.f32 %v137_v62, %v75_v58  ;;  %v77_v15 = vadd.f32 %v249_v2, %v54_v63  ;;  %v139_v16 = vadd.f32 %v263_v6, %v116_v0  ;;  %v117_v20 = vmul.f32 %v258_v5, %v94_v3 }
  0x11   :  { %183 = vst [vmem:[%s472_s6 + $0x20] sm:$0xff] %v167_v7  ;;  %v154_v18 = vadd.f32 %v138_v9, %v76_v8  ;;  %v78_v19 = vadd.f32 %v249_v2, %v55_v10  ;;  %v56_v21 = vmul.f32 %v244_v1, %v33_v4  ;;  %184 = vst [vmem:[%s472_s6 + $0x28] sm:$0xff] %v168_v13 }
  0x12   :  { %v169_v23 = vmax.f32 %v153_v14, 0.0  ;;  %v155_v24 = vadd.f32 %v139_v16, %v77_v15  ;;  %v118_v25 = vmul.f32 %v258_v5, %v95_v11  ;;  %v57_v26 = vmul.f32 %v244_v1, %v34_v12 }
  0x13   :  { %v170_v29 = vmax.f32 %v154_v18, 0.0  ;;  %v140_v30 = vadd.f32 %v263_v6, %v117_v20  ;;  %v79_v31 = vadd.f32 %v249_v2, %v56_v21  ;;  %v119_v32 = vmul.f32 %v258_v5, %v96_v17 }
  0x14   :  { %185 = vst [vmem:[%s472_s6 + $0x30] sm:$0xff] %v169_v23  ;;  %v171_v35 = vmax.f32 %v155_v24, 0.0  ;;  %v141_v36 = vadd.f32 %v263_v6, %v118_v25  ;;  %v80_v37 = vadd.f32 %v249_v2, %v57_v26  ;;  %v58_v38 = vmul.f32 %v244_v1, %v35_v22 }
  0x15   :  { %186 = vst [vmem:[%s472_s6 + $0x38] sm:$0xff] %v170_v29  ;;  %v156_v39 = vadd.f32 %v140_v30, %v78_v19  ;;  %v142_v40 = vadd.f32 %v263_v6, %v119_v32  ;;  %v120_v41 = vmul.f32 %v258_v5, %v97_v27  ;;  %v59_v42 = vmul.f32 %v244_v1, %v36_v28 }
  0x16   :  { %187 = vst [vmem:[%s472_s6 + $0x40] sm:$0xff] %v171_v35  ;;  %v157_v44 = vadd.f32 %v141_v36, %v79_v31  ;;  %v81_v45 = vadd.f32 %v249_v2, %v58_v38  ;;  %v121_v46 = vmul.f32 %v258_v5, %v98_v33  ;;  %v60_v47 = vmul.f32 %v244_v1, %v37_v34 }
  0x17   :  { %v172_v50 = vmax.f32 %v156_v39, 0.0  ;;  %v158_v51 = vadd.f32 %v142_v40, %v80_v37  ;;  %v143_v52 = vadd.f32 %v263_v6, %v120_v41  ;;  %v82_v53 = vadd.f32 %v249_v2, %v59_v42 }
  0x18   :  { %v173_v54 = vmax.f32 %v157_v44, 0.0  ;;  %v144_v55 = vadd.f32 %v263_v6, %v121_v46  ;;  %v83_v56 = vadd.f32 %v249_v2, %v60_v47  ;;  %v122_v57 = vmul.f32 %v258_v5, %v99_v43 }
  0x19   :  { %188 = vst [vmem:[%s472_s6 + $0x48] sm:$0xff] %v172_v50  ;;  %v174_v58 = vmax.f32 %v158_v51, 0.0  ;;  %v159_v59 = vadd.f32 %v143_v52, %v81_v45  ;;  %v61_v60 = vmul.f32 %v244_v1, %v38_v48  ;;  %v123_v61 = vmul.f32 %v258_v5, %v100_v49 }
  0x1a   :  { %189 = vst [vmem:[%s472_s6 + $0x50] sm:$0xff] %v173_v54  ;;  %v160_v62 = vadd.f32 %v144_v55, %v82_v53  ;;  %v145_v63 = vadd.f32 %v263_v6, %v122_v57 }
  0x1b   :  { %190 = vst [vmem:[%s472_s6 + $0x58] sm:$0xff] %v174_v58  ;;  %v175_v0 = vmax.f32 %v159_v59, 0.0  ;;  %v84_v3 = vadd.f32 %v249_v2, %v61_v60  ;;  %v146_v4 = vadd.f32 %v263_v6, %v123_v61 }
  0x1c   :  { %v176_v7 = vmax.f32 %v160_v62, 0.0  ;;  %v161_v1 = vadd.f32 %v145_v63, %v83_v56 }
  0x1d   :  { %191 = vst [vmem:[%s472_s6 + $0x60] sm:$0xff] %v175_v0  ;;  %v162_v5 = vadd.f32 %v146_v4, %v84_v3 }
  0x1e   :  { %192 = vst [vmem:[%s472_s6 + $0x68] sm:$0xff] %v176_v7  ;;  %v177_v8 = vmax.f32 %v161_v1, 0.0 }
  0x1f   :  { %v178_v9 = vmax.f32 %v162_v5, 0.0 }
  0x20   :  { %193 = vst [vmem:[%s472_s6 + $0x70] sm:$0xff] %v177_v8 }
  0x21   :  { %194 = vst [vmem:[%s472_s6 + $0x78] sm:$0xff] %v178_v9 }

</bundles_post_ra>
